<compile_context>
chip_gen: v6e
topology: v6e:2x2x1
jax: 0.10.0
libtpu: 0.0.40
codegen_flags: <defaults>
</compile_context>

<pallas_src>
import jax
import jax.numpy as jnp
from jax.experimental import pallas as pl
from jax.experimental import pallas as _pl_unused  # noqa: F401
from jax.experimental.pallas import tpu as pltpu  # noqa: F401  (kept for gen-specific tuning hooks)


def _make_fused_mlp_kernel(n_layers: int):
    """Kernel computing the whole MLP: x -> (dot + bias [+ relu]) * n_layers."""

    def kernel(*refs):
        # refs = (x_ref, w0_ref, b0_ref, w1_ref, b1_ref, ..., o_ref)
        x_ref = refs[0]
        o_ref = refs[-1]
        wb_refs = refs[1:-1]

        h = x_ref[...]  # [M, K0], f32
        for i in range(n_layers):
            w_ref = wb_refs[2 * i]       # [K_i, N_i]  (pre-transposed)
            b_ref = wb_refs[2 * i + 1]   # [1, N_i]
            h = jnp.dot(h, w_ref[...], preferred_element_type=jnp.float32)
            h = h + b_ref[...]
            if i < n_layers - 1:
                h = jnp.maximum(h, 0.0)  # fused ReLU, stays in vregs
        o_ref[...] = h.astype(o_ref.dtype)

    return kernel


def mlp_pallas(x2d, params):
    """Fused MLP forward: x2d [M, K0] f32, params = [(W_t [K,N], b [1,N]), ...]."""
    M, K0 = x2d.shape
    n_layers = len(params)
    assert n_layers >= 1

    inputs = [x2d]
    in_specs = [pl.BlockSpec((M, K0), lambda: (0, 0))]

    flops = 0
    bytes_accessed = x2d.size * x2d.dtype.itemsize
    for w_t, b in params:
        k, n = w_t.shape
        assert b.shape == (1, n), (w_t.shape, b.shape)
        inputs.append(w_t)
        inputs.append(b)
        # Full-array blocks (block_shape == array dims -> always legal).
        in_specs.append(pl.BlockSpec((k, n), lambda: (0, 0)))
        in_specs.append(pl.BlockSpec((1, n), lambda: (0, 0)))
        flops += 2 * M * k * n
        bytes_accessed += (w_t.size + b.size) * 4

    n_out = params[-1][0].shape[1]
    bytes_accessed += M * n_out * 4

    return pl.pallas_call(
        _make_fused_mlp_kernel(n_layers),
        out_shape=jax.ShapeDtypeStruct((M, n_out), jnp.float32),
        in_specs=in_specs,
        out_specs=pl.BlockSpec((M, n_out), lambda: (0, 0)),
        cost_estimate=pl.CostEstimate(
            flops=flops, transcendentals=0, bytes_accessed=bytes_accessed
        ),
    )(*inputs)


def init_mlp_params(key, layer_dims):
    """Params matching nn.Linear init (uniform(-1/sqrt(fan_in), 1/sqrt(fan_in))),
    stored PRE-TRANSPOSED as W_t [in, out] and b [1, out] so the forward path
    does no per-call transpose/reshape."""
    params = []
    for ix in range(1, len(layer_dims)):
        fan_in = layer_dims[ix - 1]
        fan_out = layer_dims[ix]
        key, kw, kb = jax.random.split(key, 3)
        bound = 1.0 / jnp.sqrt(jnp.float32(fan_in))
        w_t = jax.random.uniform(kw, (fan_in, fan_out), jnp.float32, -bound, bound)
        b = jax.random.uniform(kb, (1, fan_out), jnp.float32, -bound, bound)
        params.append((w_t, b))
    return params


def mlp_forward(x, params, layer_dims):
    """Matches MLP.forward: flatten (start_dim=1 if ndim>1, else full flatten),
    then chained Linear(+ReLU) layers."""
    if x.ndim > 1:
        x2d = x.reshape(x.shape[0], -1)   # torch.flatten(x, start_dim=1)
        squeeze_out = False
    else:
        x2d = x.reshape(1, -1)            # torch.flatten(x) -> treat as batch 1
        squeeze_out = True
    assert x2d.shape[-1] == layer_dims[0], (x2d.shape, layer_dims)

    out = mlp_pallas(x2d.astype(jnp.float32), params)

    if squeeze_out:
        out = out.reshape(-1)
    return out


if __name__ == "__main__":
    key = jax.random.PRNGKey(0)

    # Image-like input flattened into the MLP: [batch=2, channels=4, 16, 16]
    # -> 1024 input features; hidden dims 32, 32; output dim 8.
    layer_dims = [4 * 16 * 16, 32, 32, 8]

    key, kx, kp = jax.random.split(key, 3)
    x = jax.random.normal(kx, (2, 4, 16, 16), jnp.float32)
    params = init_mlp_params(kp, layer_dims)

    out = jax.block_until_ready(mlp_forward(x, params, layer_dims))
    assert out.shape == (2, layer_dims[-1]), out.shape

    # Reference check (pure JAX) to make sure the fused kernel matches
    # Linear(+ReLU) chain semantics.
    h_ref = x.reshape(2, -1)
    for i, (w_t, b) in enumerate(params):
        h_ref = h_ref @ w_t + b
        if i < len(params) - 1:
            h_ref = jnp.maximum(h_ref, 0.0)
    assert jnp.allclose(out, h_ref, atol=1e-4, rtol=1e-4)

    # Also exercise the 1-D input path (torch.flatten on a 1-D input).
    x1d = jax.random.normal(key, (layer_dims[0],), jnp.float32)
    out1d = jax.block_until_ready(mlp_forward(x1d, params, layer_dims))
    assert out1d.shape == (layer_dims[-1],), out1d.shape

    print("KERNEL_OK")
</pallas_src>

<mosaic_0001>
module attributes {stable_mosaic.version = 11 : i64} {
  func.func @kernel(%arg0: memref<2x1024xf32, #tpu.memory_space<vmem>>, %arg1: memref<1024x32xf32, #tpu.memory_space<vmem>>, %arg2: memref<1x32xf32, #tpu.memory_space<vmem>>, %arg3: memref<32x32xf32, #tpu.memory_space<vmem>>, %arg4: memref<1x32xf32, #tpu.memory_space<vmem>>, %arg5: memref<32x8xf32, #tpu.memory_space<vmem>>, %arg6: memref<1x8xf32, #tpu.memory_space<vmem>>, %arg7: memref<2x8xf32, #tpu.memory_space<vmem>>) attributes {dimension_semantics = [], scalar_prefetch = 0 : i64, scratch_operands = 0 : i64, tpu.core_type = #tpu.core_type<tc>} {
    %c0 = arith.constant 0 : index
    %c0_0 = arith.constant 0 : index
    %0 = vector.load %arg0[%c0, %c0_0] : memref<2x1024xf32, #tpu.memory_space<vmem>>, vector<2x1024xf32>
    %c0_1 = arith.constant 0 : index
    %c0_2 = arith.constant 0 : index
    %1 = vector.load %arg1[%c0_1, %c0_2] : memref<1024x32xf32, #tpu.memory_space<vmem>>, vector<1024x32xf32>
    %cst = arith.constant dense<0.000000e+00> : vector<2x32xf32>
    %2 = tpu.matmul %0, %1, %cst {dimension_numbers = #tpu.dot_dimension_numbers<[1], [0], [0], [1], [0, 0, 1, 1], [], []>} : vector<2x1024xf32>, vector<1024x32xf32>, vector<2x32xf32> -> vector<2x32xf32>
    %c0_3 = arith.constant 0 : index
    %c0_4 = arith.constant 0 : index
    %3 = vector.load %arg2[%c0_3, %c0_4] : memref<1x32xf32, #tpu.memory_space<vmem>>, vector<1x32xf32>
    %4 = vector.broadcast %3 : vector<1x32xf32> to vector<2x32xf32>
    %5 = arith.addf %2, %4 : vector<2x32xf32>
    %cst_5 = arith.constant 0.000000e+00 : f32
    %6 = vector.broadcast %cst_5 : f32 to vector<2x32xf32>
    %7 = arith.maximumf %5, %6 : vector<2x32xf32>
    %c0_6 = arith.constant 0 : index
    %c0_7 = arith.constant 0 : index
    %8 = vector.load %arg3[%c0_6, %c0_7] : memref<32x32xf32, #tpu.memory_space<vmem>>, vector<32x32xf32>
    %cst_8 = arith.constant dense<0.000000e+00> : vector<2x32xf32>
    %9 = tpu.matmul %7, %8, %cst_8 {dimension_numbers = #tpu.dot_dimension_numbers<[1], [0], [0], [1], [0, 0, 1, 1], [], []>} : vector<2x32xf32>, vector<32x32xf32>, vector<2x32xf32> -> vector<2x32xf32>
    %c0_9 = arith.constant 0 : index
    %c0_10 = arith.constant 0 : index
    %10 = vector.load %arg4[%c0_9, %c0_10] : memref<1x32xf32, #tpu.memory_space<vmem>>, vector<1x32xf32>
    %11 = vector.broadcast %10 : vector<1x32xf32> to vector<2x32xf32>
    %12 = arith.addf %9, %11 : vector<2x32xf32>
    %cst_11 = arith.constant 0.000000e+00 : f32
    %13 = vector.broadcast %cst_11 : f32 to vector<2x32xf32>
    %14 = arith.maximumf %12, %13 : vector<2x32xf32>
    %c0_12 = arith.constant 0 : index
    %c0_13 = arith.constant 0 : index
    %15 = vector.load %arg5[%c0_12, %c0_13] : memref<32x8xf32, #tpu.memory_space<vmem>>, vector<32x8xf32>
    %cst_14 = arith.constant dense<0.000000e+00> : vector<2x8xf32>
    %16 = tpu.matmul %14, %15, %cst_14 {dimension_numbers = #tpu.dot_dimension_numbers<[1], [0], [0], [1], [0, 0, 1, 1], [], []>} : vector<2x32xf32>, vector<32x8xf32>, vector<2x8xf32> -> vector<2x8xf32>
    %c0_15 = arith.constant 0 : index
    %c0_16 = arith.constant 0 : index
    %17 = vector.load %arg6[%c0_15, %c0_16] : memref<1x8xf32, #tpu.memory_space<vmem>>, vector<1x8xf32>
    %18 = vector.broadcast %17 : vector<1x8xf32> to vector<2x8xf32>
    %19 = arith.addf %16, %18 : vector<2x8xf32>
    %c0_17 = arith.constant 0 : index
    %c0_18 = arith.constant 0 : index
    %20 = vector.load %arg7[%c0_17, %c0_18] : memref<2x8xf32, #tpu.memory_space<vmem>>, vector<2x8xf32>
    tpu.vector_store %arg7[%c0_17, %c0_18], %19 {strides = array<i32>} : memref<2x8xf32, #tpu.memory_space<vmem>>, vector<2x8xf32>,
    return
  }
}

</mosaic_0001>

<bundles_post_ra>
// kernel: tpu_custom_call.1
= control target key start
LH: loop header
LB: loop body
LE: loop exit
PB: predicated region body
PF: predicated region fallthrough
CT: control target
= control target key end

     0   :  { %v880_v30 = vmov 1983009808   ;;  %v170_v32 = vlaneseq  ;;  %s1358_s0 = inlined_call_operand.vmem [shape: f32[2,1024], index: 0, kind: input, shape index: {}]   ;;  %s1359_s1 = inlined_call_operand.vmem [shape: f32[1024,32], index: 1, kind: input, shape index: {}]   ;;  %s1360_s2 = inlined_call_operand.vmem [shape: f32[1,32], index: 2, kind: input, shape index: {}]   ;;  %s1361_s3 = inlined_call_operand.vmem [shape: f32[32,32], index: 3, kind: input, shape index: {}]   ;;  %s1362_s4 = inlined_call_operand.vmem [shape: f32[1,32], index: 4, kind: input, shape index: {}]   ;;  %s1363_s5 = inlined_call_operand.vmem [shape: f32[32,8], index: 5, kind: input, shape index: {}]   ;;  %s1364_s6 = inlined_call_operand.vmem [shape: f32[1,8], index: 6, kind: input, shape index: {}]   ;;  %s1365_s7 = inlined_call_operand.hbm [shape: f32[2,8], index: 7, kind: output, shape index: {}]  }
   0x1   :  { %v60_v0 = vld [vmem:[%s1359_s1 + $0xf8] sm:$0xff]  ;;  %v59_v4 = vld [vmem:[%s1359_s1 + $0xf0] sm:$0xff]  ;;  %v58_v8 = vld [vmem:[%s1359_s1 + $0xe8] sm:$0xff]  ;;  %v168_v31 = vunpack.c.l.s4 %v880_v30 }
   0x2   :  { %v92_v1 = vld [vmem:[%s1359_s1 + $0x1f8] sm:$0xff]  ;;  %680 = vmatprep.subr.mxu0 %v60_v0  ;;  %v91_v5 = vld [vmem:[%s1359_s1 + $0x1f0] sm:$0xff]  ;;  %v90_v9 = vld [vmem:[%s1359_s1 + $0x1e8] sm:$0xff]  ;;  %v171_v42 = vshrl.u32 %v170_v32, 7 }
   0x3   :  { %v44_v2 = vld [vmem:[%s1359_s1 + $0x78] sm:$0xff]  ;;  %715 = vmatprep.subr.mxu1 %v92_v1  ;;  %v43_v6 = vld [vmem:[%s1359_s1 + $0x70] sm:$0xff]  ;;  %v42_v10 = vld [vmem:[%s1359_s1 + $0x68] sm:$0xff]  ;;  %v169_v41 = vunpack.c.0.s8 %v168_v31 }
   0x4   :  { %v76_v3 = vld [vmem:[%s1359_s1 + $0x178] sm:$0xff]  ;;  %681 = vmatpush3.msra.mxu0 %v44_v2  ;;  %v75_v7 = vld [vmem:[%s1359_s1 + $0x170] sm:$0xff]  ;;  %v74_v11 = vld [vmem:[%s1359_s1 + $0x168] sm:$0xff] }
   0x5   :  { %716 = vmatpush3.msra.mxu1 %v76_v3  ;;  %682 = vmatprep.subr.mxu0 %v59_v4  ;;  %v57_v12 = vld [vmem:[%s1359_s1 + $0xe0] sm:$0xff]  ;;  %v56_v16 = vld [vmem:[%s1359_s1 + $0xd8] sm:$0xff]  ;;  %v55_v20 = vld [vmem:[%s1359_s1 + $0xd0] sm:$0xff]  ;;  %v1062_v51 = vsub.s32 %v169_v41, %v171_v42 }
   0x6   :  { %717 = vmatprep.subr.mxu1 %v91_v5  ;;  %683 = vmatpush3.msra.mxu0 %v43_v6  ;;  %v89_v13 = vld [vmem:[%s1359_s1 + $0x1e0] sm:$0xff]  ;;  %v88_v17 = vld [vmem:[%s1359_s1 + $0x1d8] sm:$0xff]  ;;  %v87_v21 = vld [vmem:[%s1359_s1 + $0x1d0] sm:$0xff] }
   0x7   :  { %718 = vmatpush3.msra.mxu1 %v75_v7  ;;  %684 = vmatprep.subr.mxu0 %v58_v8  ;;  %v41_v14 = vld [vmem:[%s1359_s1 + $0x60] sm:$0xff]  ;;  %v40_v18 = vld [vmem:[%s1359_s1 + $0x58] sm:$0xff]  ;;  %v39_v22 = vld [vmem:[%s1359_s1 + $0x50] sm:$0xff] }
   0x8   :  { %719 = vmatprep.subr.mxu1 %v90_v9  ;;  %v73_v15 = vld [vmem:[%s1359_s1 + $0x160] sm:$0xff]  ;;  %685 = vmatpush3.msra.mxu0 %v42_v10  ;;  %v72_v19 = vld [vmem:[%s1359_s1 + $0x158] sm:$0xff]  ;;  %v71_v23 = vld [vmem:[%s1359_s1 + $0x150] sm:$0xff] }
   0x9   :  { %720 = vmatpush3.msra.mxu1 %v74_v11  ;;  %686 = vmatprep.subr.mxu0 %v57_v12  ;;  %v54_v24 = vld [vmem:[%s1359_s1 + $0xc8] sm:$0xff]  ;;  %v53_v28 = vld [vmem:[%s1359_s1 + $0xc0] sm:$0xff]  ;;  %v52_v35 = vld [vmem:[%s1359_s1 + $0xb8] sm:$0xff] }
   0xa   :  { %721 = vmatprep.subr.mxu1 %v89_v13  ;;  %687 = vmatpush3.msra.mxu0 %v41_v14  ;;  %v86_v25 = vld [vmem:[%s1359_s1 + $0x1c8] sm:$0xff]  ;;  %v85_v29 = vld [vmem:[%s1359_s1 + $0x1c0] sm:$0xff]  ;;  %v84_v36 = vld [vmem:[%s1359_s1 + $0x1b8] sm:$0xff] }
   0xb   :  { %722 = vmatpush3.msra.mxu1 %v73_v15  ;;  %688 = vmatprep.subr.mxu0 %v56_v16  ;;  %v38_v26 = vld [vmem:[%s1359_s1 + $0x48] sm:$0xff]  ;;  %v37_v33 = vld [vmem:[%s1359_s1 + $0x40] sm:$0xff]  ;;  %v36_v37 = vld [vmem:[%s1359_s1 + $0x38] sm:$0xff] }
   0xc   :  { %723 = vmatprep.subr.mxu1 %v88_v17  ;;  %689 = vmatpush3.msra.mxu0 %v40_v18  ;;  %v70_v27 = vld [vmem:[%s1359_s1 + $0x148] sm:$0xff]  ;;  %v69_v34 = vld [vmem:[%s1359_s1 + $0x140] sm:$0xff]  ;;  %v68_v38 = vld [vmem:[%s1359_s1 + $0x138] sm:$0xff] }
   0xd   :  { %724 = vmatpush3.msra.mxu1 %v72_v19  ;;  %690 = vmatprep.subr.mxu0 %v55_v20  ;;  %v51_v39 = vld [vmem:[%s1359_s1 + $0xb0] sm:$0xff]  ;;  %v50_v45 = vld [vmem:[%s1359_s1 + $0xa8] sm:$0xff]  ;;  %v49_v49 = vld [vmem:[%s1359_s1 + $0xa0] sm:$0xff] }
   0xe   :  { %725 = vmatprep.subr.mxu1 %v87_v21  ;;  %691 = vmatpush3.msra.mxu0 %v39_v22  ;;  %v83_v40 = vld [vmem:[%s1359_s1 + $0x1b0] sm:$0xff]  ;;  %v82_v46 = vld [vmem:[%s1359_s1 + $0x1a8] sm:$0xff]  ;;  %v81_v50 = vld [vmem:[%s1359_s1 + $0x1a0] sm:$0xff] }
   0xf   :  { %726 = vmatpush3.msra.mxu1 %v71_v23  ;;  %692 = vmatprep.subr.mxu0 %v54_v24  ;;  %v35_v43 = vld [vmem:[%s1359_s1 + $0x30] sm:$0xff]  ;;  %v34_v47 = vld [vmem:[%s1359_s1 + $0x28] sm:$0xff]  ;;  %v33_v52 = vld [vmem:[%s1359_s1 + $0x20] sm:$0xff] }
  0x10   :  { %727 = vmatprep.subr.mxu1 %v86_v25  ;;  %693 = vmatpush3.msra.mxu0 %v38_v26  ;;  %v67_v44 = vld [vmem:[%s1359_s1 + $0x130] sm:$0xff]  ;;  %v66_v48 = vld [vmem:[%s1359_s1 + $0x128] sm:$0xff]  ;;  %v65_v53 = vld [vmem:[%s1359_s1 + $0x120] sm:$0xff] }
  0x11   :  { %728 = vmatpush3.msra.mxu1 %v70_v27  ;;  %694 = vmatprep.subr.mxu0 %v53_v28  ;;  %v27_v54 = vld [vmem:[%s1358_s0] sm:$0xff]  ;;  %v48_v55 = vld [vmem:[%s1359_s1 + $0x98] sm:$0xff]  ;;  %v47_v60 = vld [vmem:[%s1359_s1 + $0x90] sm:$0xff] }
  0x12   :  { %729 = vmatprep.subr.mxu1 %v85_v29  ;;  %695 = vmatpush3.msra.mxu0 %v37_v33  ;;  %v80_v56 = vld [vmem:[%s1359_s1 + $0x198] sm:$0xff]  ;;  %v166_v57 = vcombine.high %v27_v54, %v27_v54  ;;  %v79_v61 = vld [vmem:[%s1359_s1 + $0x190] sm:$0xff]  ;;  %v173_v62 = vrot.slane %v27_v54, %v1062_v51  ;;  %v46_v1 = vld [vmem:[%s1359_s1 + $0x88] sm:$0xff] }
  0x13   :  { %730 = vmatpush3.msra.mxu1 %v69_v34  ;;  %696 = vmatprep.subr.mxu0 %v52_v35  ;;  %v32_v58 = vld [vmem:[%s1359_s1 + $0x18] sm:$0xff]  ;;  %v31_v63 = vld [vmem:[%s1359_s1 + $0x10] sm:$0xff]  ;;  %v78_v2 = vld [vmem:[%s1359_s1 + $0x188] sm:$0xff] }
  0x14   :  { %731 = vmatprep.subr.mxu1 %v84_v36  ;;  %697 = vmatpush3.msra.mxu0 %v36_v37  ;;  %v64_v59 = vld [vmem:[%s1359_s1 + $0x118] sm:$0xff]  ;;  %v63_v0 = vld [vmem:[%s1359_s1 + $0x110] sm:$0xff]  ;;  %v180_v3 = vrot.slane %v166_v57, %v1062_v51  ;;  %v30_v4 = vld [vmem:[%s1359_s1 + $0x8] sm:$0xff]  ;;  %v181_v8 = vcombine.high %v173_v62, %v173_v62 }
  0x15   :  { %732 = vmatpush3.msra.mxu1 %v68_v38  ;;  %698 = vmatprep.subr.mxu0 %v51_v39  ;;  %v62_v5 = vld [vmem:[%s1359_s1 + $0x108] sm:$0xff]  ;;  %v45_v6 = vld [vmem:[%s1359_s1 + $0x80] sm:$0xff]  ;;  %v124_v12 = vld [vmem:[%s1359_s1 + $0x2f8] sm:$0xff] }
  0x16   :  { %733 = vmatprep.subr.mxu1 %v83_v40  ;;  %699 = vmatpush3.msra.mxu0 %v35_v43  ;;  %v77_v7 = vld [vmem:[%s1359_s1 + $0x180] sm:$0xff]  ;;  %v182_v11 = vcombine.high %v180_v3, %v180_v3  ;;  %v156_v13 = vld [vmem:[%s1359_s1 + $0x3f8] sm:$0xff]  ;;  %v123_v16 = vld [vmem:[%s1359_s1 + $0x2f0] sm:$0xff] }
  0x17   :  { %734 = vmatpush3.msra.mxu1 %v67_v44  ;;  %700 = vmatprep.subr.mxu0 %v50_v45  ;;  %v29_v9 = vld [vmem:[%s1359_s1] sm:$0xff]  ;;  %v108_v14 = vld [vmem:[%s1359_s1 + $0x278] sm:$0xff]  ;;  %v155_v17 = vld [vmem:[%s1359_s1 + $0x3f0] sm:$0xff] }
  0x18   :  { %735 = vmatprep.subr.mxu1 %v82_v46  ;;  %701 = vmatpush3.msra.mxu0 %v34_v47  ;;  %v61_v10 = vld [vmem:[%s1359_s1 + $0x100] sm:$0xff]  ;;  %v140_v15 = vld [vmem:[%s1359_s1 + $0x378] sm:$0xff]  ;;  %v107_v18 = vld [vmem:[%s1359_s1 + $0x270] sm:$0xff] }
  0x19   :  { %736 = vmatpush3.msra.mxu1 %v66_v48  ;;  %702 = vmatprep.subr.mxu0 %v49_v49  ;;  %v139_v19 = vld [vmem:[%s1359_s1 + $0x370] sm:$0xff]  ;;  %v122_v20 = vld [vmem:[%s1359_s1 + $0x2e8] sm:$0xff]  ;;  %v121_v24 = vld [vmem:[%s1359_s1 + $0x2e0] sm:$0xff] }
  0x1a   :  { %737 = vmatprep.subr.mxu1 %v81_v50  ;;  %703 = vmatpush3.msra.mxu0 %v33_v52  ;;  %v154_v21 = vld [vmem:[%s1359_s1 + $0x3e8] sm:$0xff]  ;;  %v153_v25 = vld [vmem:[%s1359_s1 + $0x3e0] sm:$0xff]  ;;  %v120_v28 = vld [vmem:[%s1359_s1 + $0x2d8] sm:$0xff] }
  0x1b   :  { %738 = vmatpush3.msra.mxu1 %v65_v53  ;;  %704 = vmatprep.subr.mxu0 %v48_v55  ;;  %v106_v22 = vld [vmem:[%s1359_s1 + $0x268] sm:$0xff]  ;;  %v105_v26 = vld [vmem:[%s1359_s1 + $0x260] sm:$0xff]  ;;  %v152_v29 = vld [vmem:[%s1359_s1 + $0x3d8] sm:$0xff] }
  0x1c   :  { %739 = vmatprep.subr.mxu1 %v80_v56  ;;  %705 = vmatpush3.msra.mxu0 %v32_v58  ;;  %v138_v23 = vld [vmem:[%s1359_s1 + $0x368] sm:$0xff]  ;;  %v137_v27 = vld [vmem:[%s1359_s1 + $0x360] sm:$0xff]  ;;  %v104_v30 = vld [vmem:[%s1359_s1 + $0x258] sm:$0xff] }
  0x1d   :  { %740 = vmatpush3.msra.mxu1 %v64_v59  ;;  %706 = vmatprep.subr.mxu0 %v47_v60  ;;  %v136_v31 = vld [vmem:[%s1359_s1 + $0x358] sm:$0xff]  ;;  %v119_v32 = vld [vmem:[%s1359_s1 + $0x2d0] sm:$0xff] }
  0x1e   :  { %741 = vmatprep.subr.mxu1 %v79_v61  ;;  %707 = vmatpush3.msra.mxu0 %v31_v63  ;;  %v151_v33 = vld [vmem:[%s1359_s1 + $0x3d0] sm:$0xff] }
  0x1f   :  { %742 = vmatpush3.msra.mxu1 %v63_v0  ;;  %708 = vmatprep.subr.mxu0 %v46_v1  ;;  %v103_v34 = vld [vmem:[%s1359_s1 + $0x250] sm:$0xff] }
  0x20   :  { %743 = vmatprep.subr.mxu1 %v78_v2  ;;  %709 = vmatpush3.msra.mxu0 %v30_v4  ;;  %v135_v35 = vld [vmem:[%s1359_s1 + $0x350] sm:$0xff] }
  0x21   :  { %744 = vmatpush3.msra.mxu1 %v62_v5  ;;  %710 = vmatprep.subr.mxu0 %v45_v6 }
  0x22   :  { %745 = vmatprep.subr.mxu1 %v77_v7  ;;  %711 = vmatpush3.msra.mxu0 %v29_v9 }
  0x23   :  { %272 = vmatprep.mubr.f32.mxu0 %v181_v8  ;;  %746 = vmatpush3.msra.mxu1 %v61_v10 }
  0x24   :  { %273 = vmatmul.mubr.f32.vlgmr.msra.gmra.mxu0 %v173_v62  ;;  %342 = vmatprep.mubr.f32.mxu1 %v182_v11 }
  0x25   :  { %750 = vmatprep.subr.mxu0 %v124_v12  ;;  %785 = vmatprep.subr.mxu1 %v156_v13 }
  0x26   :  { %343 = vmatmul.mubr.f32.vlgmr.msra.gmra.mxu1 %v180_v3  ;;  %751 = vmatpush3.msra.mxu0 %v108_v14 }
  0x27   :  { %786 = vmatpush3.msra.mxu1 %v140_v15  ;;  %752 = vmatprep.subr.mxu0 %v123_v16 }
  0x28   :  { %787 = vmatprep.subr.mxu1 %v155_v17  ;;  %753 = vmatpush3.msra.mxu0 %v107_v18 }
  0x29   :  { %788 = vmatpush3.msra.mxu1 %v139_v19  ;;  %754 = vmatprep.subr.mxu0 %v122_v20 }
  0x2a   :  { %789 = vmatprep.subr.mxu1 %v154_v21  ;;  %755 = vmatpush3.msra.mxu0 %v106_v22 }
  0x2b   :  { %790 = vmatpush3.msra.mxu1 %v138_v23  ;;  %756 = vmatprep.subr.mxu0 %v121_v24 }
  0x2c   :  { %791 = vmatprep.subr.mxu1 %v153_v25  ;;  %757 = vmatpush3.msra.mxu0 %v105_v26 }
  0x2d   :  { %792 = vmatpush3.msra.mxu1 %v137_v27  ;;  %758 = vmatprep.subr.mxu0 %v120_v28 }
  0x2e   :  { %793 = vmatprep.subr.mxu1 %v152_v29 }
  0x2f   :  { %12 = vsyncpa [#allocation3], 0  ;;  %759 = vmatpush3.msra.mxu0 %v104_v30  ;;  %794 = vmatpush3.msra.mxu1 %v136_v31  ;;  %v118_v36 = vld [vmem:[%s1359_s1 + $0x2c8] sm:$0xff]  ;;  %v117_v40 = vld [vmem:[%s1359_s1 + $0x2c0] sm:$0xff]  ;;  %v881_v18 = vmov 0.0   ;;  %vm882_vm0 = vmmov 0  }
  0x30   :  { %v150_v37 = vld [vmem:[%s1359_s1 + $0x3c8] sm:$0xff]  ;;  %760 = vmatprep.subr.mxu0 %v119_v32  ;;  %795 = vmatprep.subr.mxu1 %v151_v33  ;;  %v149_v41 = vld [vmem:[%s1359_s1 + $0x3c0] sm:$0xff]  ;;  %v116_v44 = vld [vmem:[%s1359_s1 + $0x2b8] sm:$0xff]  ;;  %vm500_vm1 = vcmask 261120   ;;  %s883_s24 = smov [#allocation2]   ;;  %vm659_vm2 = vcmask 58368  }
  0x31   :  { %v102_v38 = vld [vmem:[%s1359_s1 + $0x248] sm:$0xff]  ;;  %761 = vmatpush3.msra.mxu0 %v103_v34  ;;  %796 = vmatpush3.msra.mxu1 %v135_v35  ;;  %v101_v42 = vld [vmem:[%s1359_s1 + $0x240] sm:$0xff]  ;;  %v148_v45 = vld [vmem:[%s1359_s1 + $0x3b8] sm:$0xff]  ;;  %s667_s25 = sshll.u32 %s883_s24, 4  ;;  %s668_s25 = int_to_ptr.vmem [resolvable:$true] %s667_s25 }
  0x32   :  { %v134_v39 = vld [vmem:[%s1359_s1 + $0x348] sm:$0xff]  ;;  %762 = vmatprep.subr.mxu0 %v118_v36  ;;  %797 = vmatprep.subr.mxu1 %v150_v37  ;;  %v133_v43 = vld [vmem:[%s1359_s1 + $0x340] sm:$0xff]  ;;  %v100_v46 = vld [vmem:[%s1359_s1 + $0x238] sm:$0xff]  ;;  %p863_p1 = scmp.lt.s32.totalorder %s668_s25, %s668_s25 }
  0x33   :  { %763 = vmatpush3.msra.mxu0 %v102_v38  ;;  %798 = vmatpush3.msra.mxu1 %v134_v39  ;;  %v132_v47 = vld [vmem:[%s1359_s1 + $0x338] sm:$0xff]  ;;  %v115_v48 = vld [vmem:[%s1359_s1 + $0x2b0] sm:$0xff]  ;;  %v114_v53 = vld [vmem:[%s1359_s1 + $0x2a8] sm:$0xff] }
  0x34   :  { %764 = vmatprep.subr.mxu0 %v117_v40  ;;  %799 = vmatprep.subr.mxu1 %v149_v41  ;;  %v147_v49 = vld [vmem:[%s1359_s1 + $0x3b0] sm:$0xff]  ;;  %v146_v54 = vld [vmem:[%s1359_s1 + $0x3a8] sm:$0xff]  ;;  %v113_v58 = vld [vmem:[%s1359_s1 + $0x2a0] sm:$0xff] }
  0x35   :  { %765 = vmatpush3.msra.mxu0 %v101_v42  ;;  %800 = vmatpush3.msra.mxu1 %v133_v43  ;;  %v99_v50 = vld [vmem:[%s1359_s1 + $0x230] sm:$0xff]  ;;  %v28_v55 = vld [vmem:[%s1358_s0 + $0x8] sm:$0xff]  ;;  %v145_v59 = vld [vmem:[%s1359_s1 + $0x3a0] sm:$0xff] }
  0x36   :  { %766 = vmatprep.subr.mxu0 %v116_v44  ;;  %801 = vmatprep.subr.mxu1 %v148_v45  ;;  %v131_v52 = vld [vmem:[%s1359_s1 + $0x330] sm:$0xff]  ;;  %v98_v56 = vld [vmem:[%s1359_s1 + $0x228] sm:$0xff]  ;;  %v97_v60 = vld [vmem:[%s1359_s1 + $0x220] sm:$0xff]  ;;  %v183_v62 = vcombine.high %v28_v55, %v28_v55  ;;  %v190_v5 = vrot.slane %v28_v55, %v1062_v51 }
  0x37   :  { %767 = vmatpush3.msra.mxu0 %v100_v46  ;;  %802 = vmatpush3.msra.mxu1 %v132_v47  ;;  %v130_v57 = vld [vmem:[%s1359_s1 + $0x328] sm:$0xff]  ;;  %v129_v61 = vld [vmem:[%s1359_s1 + $0x320] sm:$0xff]  ;;  %v112_v63 = vld [vmem:[%s1359_s1 + $0x298] sm:$0xff] }
  0x38   :  { %768 = vmatprep.subr.mxu0 %v115_v48  ;;  %803 = vmatprep.subr.mxu1 %v147_v49  ;;  %v144_v0 = vld [vmem:[%s1359_s1 + $0x398] sm:$0xff]  ;;  %v111_v3 = vld [vmem:[%s1359_s1 + $0x290] sm:$0xff]  ;;  %v197_v8 = vrot.slane %v183_v62, %v1062_v51  ;;  %v110_v9 = vld [vmem:[%s1359_s1 + $0x288] sm:$0xff]  ;;  %v198_v14 = vcombine.high %v190_v5, %v190_v5 }
  0x39   :  { %769 = vmatpush3.msra.mxu0 %v99_v50  ;;  %804 = vmatpush3.msra.mxu1 %v131_v52  ;;  %v96_v1 = vld [vmem:[%s1359_s1 + $0x218] sm:$0xff]  ;;  %v143_v4 = vld [vmem:[%s1359_s1 + $0x390] sm:$0xff]  ;;  %v142_v10 = vld [vmem:[%s1359_s1 + $0x388] sm:$0xff] }
  0x3a   :  { %770 = vmatprep.subr.mxu0 %v114_v53  ;;  %805 = vmatprep.subr.mxu1 %v146_v54  ;;  %v128_v2 = vld [vmem:[%s1359_s1 + $0x318] sm:$0xff]  ;;  %v95_v6 = vld [vmem:[%s1359_s1 + $0x210] sm:$0xff]  ;;  %v94_v11 = vld [vmem:[%s1359_s1 + $0x208] sm:$0xff]  ;;  %v199_v16 = vcombine.high %v197_v8, %v197_v8 }
  0x3b   :  { %771 = vmatpush3.msra.mxu0 %v98_v56  ;;  %806 = vmatpush3.msra.mxu1 %v130_v57  ;;  %v127_v7 = vld [vmem:[%s1359_s1 + $0x310] sm:$0xff]  ;;  %v126_v51 = vld [vmem:[%s1359_s1 + $0x308] sm:$0xff]  ;;  %v109_v12 = vld [vmem:[%s1359_s1 + $0x280] sm:$0xff] }
  0x3c   :  { %772 = vmatprep.subr.mxu0 %v113_v58  ;;  %807 = vmatprep.subr.mxu1 %v145_v59  ;;  %v141_v13 = vld [vmem:[%s1359_s1 + $0x380] sm:$0xff]  ;;  %v492_v19 = vld [vmem:[%s1361_s3 + $0x18] sm:$0xff]  ;;  %v491_v20 = vld [vmem:[%s1361_s3 + $0x10] sm:$0xff] }
  0x3d   :  { %773 = vmatpush3.msra.mxu0 %v97_v60  ;;  %808 = vmatpush3.msra.mxu1 %v129_v61  ;;  %v93_v15 = vld [vmem:[%s1359_s1 + $0x200] sm:$0xff]  ;;  %v490_v21 = vld [vmem:[%s1361_s3 + $0x8] sm:$0xff]  ;;  %v578_v23 = vld [vmem:[%s1363_s5 + $0x18] sm:$0xff] }
  0x3e   :  { %774 = vmatprep.subr.mxu0 %v112_v63  ;;  %809 = vmatprep.subr.mxu1 %v144_v0  ;;  %v125_v17 = vld [vmem:[%s1359_s1 + $0x300] sm:$0xff]  ;;  %v577_v42 = vld [vmem:[%s1363_s5 + $0x10] sm:$0xff]  ;;  %v576_v43 = vld [vmem:[%s1363_s5 + $0x8] sm:$0xff] }
  0x3f   :  { %775 = vmatpush3.msra.mxu0 %v96_v1  ;;  %810 = vmatpush3.msra.mxu1 %v128_v2  ;;  %v489_v22 = vld [vmem:[%s1361_s3] sm:$0xff] }
  0x40   :  { %776 = vmatprep.subr.mxu0 %v111_v3  ;;  %811 = vmatprep.subr.mxu1 %v143_v4  ;;  %v675_v28 = vld [vmem:[%s1360_s2] ss:$0 sm:$0xff] }
  0x41   :  { %777 = vmatpush3.msra.mxu0 %v95_v6  ;;  %812 = vmatpush3.msra.mxu1 %v127_v7  ;;  %v575_v44 = vld [vmem:[%s1363_s5] sm:$0xff]  ;;  %s858_s5 = scalar_lea.vmem %s668_s25, 32 }
  0x42   :  { %778 = vmatprep.subr.mxu0 %v110_v9  ;;  %813 = vmatprep.subr.mxu1 %v142_v10  ;;  %v676_v45 = vld [vmem:[%s1362_s4] ss:$0 sm:$0xff]  ;;  %p859_p0 = scmp.ne.s32.totalorder %s668_s25, %s858_s5  ;;  %p864_p2 = scmp.lt.s32.totalorder %s858_s5, %s858_s5 }
  0x43   :  { %779 = vmatpush3.msra.mxu0 %v94_v11  ;;  %814 = vmatpush3.msra.mxu1 %v126_v51  ;;  %v678_v50 = vld [vmem:[%s1364_s6] ss:$0 sm:$0xff] }
  0x44   :  { %780 = vmatprep.subr.mxu0 %v109_v12  ;;  %815 = vmatprep.subr.mxu1 %v141_v13  ;;  %p865_p3 = por %p864_p2, %p863_p1 }
  0x45   :  { %781 = vmatpush3.msra.mxu0 %v93_v15  ;;  %412 = vmatprep.mubr.f32.mxu0 %v198_v14 }
  0x46   :  { %816 = vmatpush3.msra.mxu1 %v125_v17  ;;  %482 = vmatprep.mubr.f32.mxu1 %v199_v16  ;;  %p866_p4 = pnand %p865_p3, %p859_p0 }
  0x47   :  { %413 = vmatmul.mubr.f32.vlgmr.msra.gmra.mxu0 %v190_v5  ;;  %483 = vmatmul.mubr.f32.vlgmr.msra.gmra.mxu1 %v197_v8 }
  0x48   :  { %830 = vmatprep.subr.mxu0 %v881_v18  ;;  %841 = vmatprep.subr.mxu1 %v881_v18 }
  0x49   :  { %831 = vmatpush3.msra.mxu0 %v492_v19  ;;  %838 = vmatprep.mubr.msk.f32.mxu0 %vm882_vm0, %v881_v18 }
  0x4a   :  { %832 = vmatprep.subr.mxu0 %v881_v18  ;;  %849 = vmatprep.mubr.msk.f32.mxu1 %vm882_vm0, %v881_v18 }
  0x4b   :  { %833 = vmatpush3.msra.mxu0 %v491_v20  ;;  %842 = vmatpush3.msra.mxu1 %v578_v23 }
  0x4c   :  { %834 = vmatprep.subr.mxu0 %v881_v18  ;;  %843 = vmatprep.subr.mxu1 %v881_v18 }
  0x4d   :  { %835 = vmatpush3.msra.mxu0 %v490_v21  ;;  %844 = vmatpush3.msra.mxu1 %v577_v42 }
  0x4e   :  { %836 = vmatprep.subr.mxu0 %v881_v18  ;;  %845 = vmatprep.subr.mxu1 %v881_v18 }
  0x4f   :  { %837 = vmatpush3.msra.mxu0 %v489_v22  ;;  %846 = vmatpush3.msra.mxu1 %v576_v43 }
  0x50   :  { %847 = vmatprep.subr.mxu1 %v881_v18 }
  0x51   :  { %848 = vmatpush3.msra.mxu1 %v575_v44 }
  0xe4   :  { %v712_v24 = vpop.f32.mrf.mxu0 }
  0xe6   :  { %v747_v25 = vpop.f32.mrf.mxu1  ;;  %v713_v26 = vpop.f32.mrf.mxu0 }
  0xe7   :  { %v714_v27 = vadd.f32 %v713_v26, %v712_v24 }
  0xe8   :  { %v748_v29 = vpop.f32.mrf.mxu1 }
  0xe9   :  { %v275_v30 = vadd.f32 %v714_v27, %v675_v28  ;;  %v749_v31 = vadd.f32 %v748_v29, %v747_v25 }
  0xeb   :  { %v345_v36 = vadd.f32 %v749_v31, %v275_v30 }
 0x107   :  { %v782_v32 = vpop.f32.mrf.mxu0  ;;  %v817_v33 = vpop.f32.mrf.mxu1 }
 0x109   :  { %v783_v34 = vpop.f32.mrf.mxu0  ;;  %v818_v35 = vpop.f32.mrf.mxu1 }
 0x10a   :  { %v784_v37 = vadd.f32 %v783_v34, %v782_v32  ;;  %v819_v39 = vadd.f32 %v818_v35, %v817_v33 }
 0x10c   :  { %v415_v38 = vadd.f32 %v784_v37, %v345_v36 }
 0x10e   :  { %v485_v40 = vadd.f32 %v819_v39, %v415_v38 }
 0x110   :  { %v488_v41 = vmax.f32 %v485_v40, 0.0 }
 0x112   :  { %839 = vmatmul.mubr.msk.f32.vlgmr.msra.gmra.mxu0 %vm500_vm1, %v488_v41 }
 0x1d2   :  { %v570_v46 = vpop.f32.mrf.mxu0 }
 0x1d3   :  { %v571_v47 = vadd.f32 %v676_v45, %v570_v46 }
 0x1d4   :  { %v840_v48 = vpop.f32.mrf.mxu0 }
 0x1d5   :  { %v574_v49 = vmax.f32 %v571_v47, 0.0 }
 0x1d7   :  { %850 = vmatmul.mubr.msk.f32.vlgmr.msra.gmra.mxu1 %vm500_vm1, %v574_v49 }
 0x297   :  { %v655_v52 = vpop.f32.mrf.mxu1 }
 0x298   :  { %v656_v53 = vadd.f32 %v678_v50, %v655_v52 }
 0x299   :  { %v851_v54 = vpop.f32.mrf.mxu1 }
 0x29a   :  { %660 = vst.msk [vmem:[#allocation2] sm:$0x3] %vm659_vm2, %v656_v53 }
 0x29b   :  { %869 = shalt.err (!%p866_p4)
}
 0x29c   :  { %670 = dma.vmem_to_hbm [thread:$0]  %s668_s25, 32, %s1365_s7, [#allocation3]  }
 0x29d   :  { %878 = dma.done.wait [#allocation3], 32  }
 0x29e   :  { %879 = vsyncadd [#allocation3], 4294967264 }
 0x29f   :  { %674 = vsyncpa [#allocation3], 1 }

</bundles_post_ra>
